<compile_context>
chip_gen: v7x
topology: tpu7x:2x2x1
jax: 0.10.0
libtpu: 0.0.40
codegen_flags: <defaults>
</compile_context>

<pallas_src>
import jax
import jax.numpy as jnp
from jax.experimental import pallas as pl
from jax.experimental.pallas import tpu as pltpu


# ---------------------------------------------------------------------------
# Fused kernel: patch projection + cls token + pos embed + visual-prompt append
# ---------------------------------------------------------------------------
def _prompt_embed_kernel(patches_ref, w_ref, posb_ref, cls_ref, pin_ref, o_ref):
    """One grid step = Bt images.

    patches_ref: [Bt*Np, K]          bf16  im2col'd patch rows for Bt images
    w_ref:       [K, D]              bf16  conv weight as a single matmul operand
    posb_ref:    [Np, D]             f32   pos_embed[1:1+Np] + conv bias (pre-folded)
    cls_ref:     [1, D]              f32   cls_token + pos_embed[0]      (pre-folded)
    pin_ref:     [n_vpro, D]         f32   learnable input visual prompts
    o_ref:       [Bt, 1+Np+n_vpro, D]      output token sequence block
    """
    bt, _, d = o_ref.shape
    np_ = posb_ref.shape[0]
    nv = pin_ref.shape[0]

    # One big MXU matmul per grid step: bf16 inputs, f32 accumulation.
    proj = jnp.dot(patches_ref[...], w_ref[...], preferred_element_type=jnp.float32)
    # Leading-dim split (layout-free: Np is a multiple of 8) + fused bias/pos add.
    proj = proj.reshape(bt, np_, d) + posb_ref[...][None]

    # Batch-invariant rows are pure broadcasts of precomputed params.
    cls_rows = jnp.broadcast_to(cls_ref[...][None], (bt, 1, d))
    pin_rows = jnp.broadcast_to(pin_ref[...][None], (bt, nv, d))

    # Single contiguous full-block store (no sublane-offset partial stores).
    o_ref[...] = jnp.concatenate([cls_rows, proj, pin_rows], axis=1).astype(o_ref.dtype)


def _pick_batch_tile(B, Np, *, m_align=128, min_steps=2):
    """Pick Bt dividing B so M = Bt*Np is a multiple of m_align (MXU row width)
    while keeping >= min_steps grid steps for pipelining / megacore; fall back to
    the whole batch if no divisor qualifies."""
    divisors = [d for d in range(1, B + 1) if B % d == 0]
    for d in divisors:                       # smallest aligned tile leaving enough steps
        if (d * Np) % m_align == 0 and B // d >= min_steps:
            return d
    for d in divisors:                       # aligned but fewer steps
        if (d * Np) % m_align == 0:
            return d
    return B                                 # tiny batches: one step, whole batch


# ---------------------------------------------------------------------------
# Wrapper: VisionPromptLearner.forward
# ---------------------------------------------------------------------------
def vision_prompt_learner_forward(x, params, *, patch_size, n_vpro,
                                  out_dtype=jnp.bfloat16, batch_tile=None):
    B, C, H, W = x.shape
    P = patch_size
    gh, gw = H // P, W // P
    Np = gh * gw
    K = C * P * P
    D = params["w_proj"].shape[-1]
    Ntot = 1 + Np + n_vpro

    # NOTE(v6e/v7x): with the real CONCH trunk (D=768/1024) the 256-wide MXU output dim
    # is fully used; the toy D=128 benchmark only half-fills it.
    Bt = _pick_batch_tile(B, Np) if batch_tile is None else batch_tile
    assert B % Bt == 0, (B, Bt)

    # im2col -> [B*Np, K]; with allow_input_fusion XLA may fuse this reshape/transpose/
    # cast into the pallas_call input pipeline instead of a standalone HBM round trip.
    patches = x.reshape(B, C, gh, P, gw, P).transpose(0, 2, 4, 1, 3, 5)
    patches = patches.reshape(B * Np, K).astype(jnp.bfloat16)

    # Parameter prep (all trace-time, free): fold conv bias + patch pos-embed together,
    # pre-add pos_embed[0] into the cls token.  Accept b_proj as (D,) or (1, D).
    w = params["w_proj"].astype(jnp.bfloat16)
    b = params["b_proj"].reshape(1, D).astype(jnp.float32)
    pos = params["pos_embed"].reshape(1 + Np, D).astype(jnp.float32)
    posb = pos[1:] + b                                                   # [Np, D]
    cls0 = params["cls_token"].reshape(1, D).astype(jnp.float32) + pos[0:1]
    pin = params["p_input"].reshape(n_vpro, D).astype(jnp.float32)

    weights = (w, posb, cls0, pin)
    # Resident weights: constant index_map.  Default double-buffering accepted (per
    # review "or just accept the default"); revisit pl.Buffered(1) when scaling D/Np.
    w_specs = [pl.BlockSpec(t.shape, lambda i: (0, 0)) for t in weights]

    # VMEM budget: double-buffered activation tiles + (double-buffered) resident
    # weights + in-kernel f32 temporaries + headroom.  No artificial 64 MiB cap.
    out_itemsize = jnp.dtype(out_dtype).itemsize
    tile_in = Bt * Np * K * 2                          # bf16 patches block
    tile_out = Bt * Ntot * D * out_itemsize
    weight_bytes = sum(int(t.size) * t.dtype.itemsize for t in weights)
    temp_bytes = Bt * Np * D * 4 + Bt * Ntot * D * 4   # f32 proj + concat result
    vmem_limit = int(2 * (tile_in + tile_out + weight_bytes) + temp_bytes + (4 << 20))

    tokens = pl.pallas_call(
        _prompt_embed_kernel,
        out_shape=jax.ShapeDtypeStruct((B, Ntot, D), out_dtype),
        grid=(B // Bt,),
        in_specs=[pl.BlockSpec((Bt * Np, K), lambda i: (i, 0))] + w_specs,
        out_specs=pl.BlockSpec((Bt, Ntot, D), lambda i: (i, 0, 0)),
        compiler_params=pltpu.CompilerParams(
            dimension_semantics=("parallel",),
            allow_input_fusion=[True, False, False, False, False],
            vmem_limit_bytes=vmem_limit),
    )(patches, *weights)

    # forward() returns (x, self.p_visual); p_visual is a pure parameter pass-through.
    return tokens, params["p_visual"]


# ---------------------------------------------------------------------------
# Pure-JAX reference for correctness checking
# ---------------------------------------------------------------------------
def vision_prompt_learner_reference(x, params, *, patch_size, n_vpro):
    B, C, H, W = x.shape
    P = patch_size
    gh, gw = H // P, W // P
    Np = gh * gw
    D = params["w_proj"].shape[-1]
    patches = x.reshape(B, C, gh, P, gw, P).transpose(0, 2, 4, 1, 3, 5)
    patches = patches.reshape(B, Np, C * P * P)
    proj = jnp.dot(patches.astype(jnp.bfloat16),
                   params["w_proj"].astype(jnp.bfloat16),
                   preferred_element_type=jnp.float32) + params["b_proj"].reshape(1, D)[None]
    cls = jnp.broadcast_to(params["cls_token"].reshape(1, D)[None], (B, 1, D))
    tok = jnp.concatenate([cls, proj], axis=1) + params["pos_embed"][None]
    p_in = jnp.broadcast_to(params["p_input"][None], (B, n_vpro, D))
    return jnp.concatenate([tok, p_in], axis=1)


# ---------------------------------------------------------------------------
# Deterministic synthetic setup + run
# ---------------------------------------------------------------------------
if __name__ == "__main__":
    # Small, TPU-friendly shapes: D multiple of 128 lanes, K = C*P*P = 768,
    # B chosen so Bt=8 gives M = Bt*Np = 128 with 4 parallel grid steps.
    B, C, IMG, PATCH = 32, 3, 64, 16
    D, N_VPRO, LAYERS = 128, 4, 3
    GH = IMG // PATCH
    NP = GH * GH
    K = C * PATCH * PATCH

    key = jax.random.PRNGKey(0)
    keys = iter(jax.random.split(key, 16))

    def nk():
        return next(keys)

    def nrm(k, shape, s=0.02):
        return s * jax.random.normal(k, shape, dtype=jnp.float32)

    params = {
        # Conv2d(C, D, kernel=PATCH, stride=PATCH) weight pre-reshaped from
        # [D, C, PATCH, PATCH] to the equivalent [K, D] matmul operand
        # (same (c, ph, pw) contraction order as the im2col above).
        "w_proj": nrm(nk(), (K, D)),
        "b_proj": nrm(nk(), (1, D)),
        "cls_token": nrm(nk(), (1, D)),
        "pos_embed": nrm(nk(), (1 + NP, D)),
        "p_input": nrm(nk(), (N_VPRO, D)),
        # p_visual: deep-layer prompts (layers 1..L-1); returned untouched by forward().
        "p_visual": nrm(nk(), (LAYERS - 1, N_VPRO, D)),
    }
    x = jax.random.normal(nk(), (B, C, IMG, IMG), dtype=jnp.float32)

    # TODO(synk): pos_drop (nn.Dropout), patch_embed.norm and timm's dynamic pos-embed
    # resize are identity / unused at inference for the standard ViT trunk; not modeled.
    ref = vision_prompt_learner_reference(x, params, patch_size=PATCH, n_vpro=N_VPRO)

    # f32 output path: strict parity with the pure-JAX reference.
    out_f32, p_visual = vision_prompt_learner_forward(
        x, params, patch_size=PATCH, n_vpro=N_VPRO, out_dtype=jnp.float32)
    out_f32 = jax.block_until_ready(out_f32)
    assert out_f32.shape == (B, 1 + NP + N_VPRO, D), out_f32.shape
    assert p_visual.shape == (LAYERS - 1, N_VPRO, D), p_visual.shape
    assert bool(jnp.all(jnp.isfinite(out_f32)))
    err32 = float(jnp.max(jnp.abs(out_f32 - ref)))
    assert jnp.allclose(out_f32, ref, atol=1e-3, rtol=1e-3), err32

    # bf16 output path (default): halves the output writeback; bf16-rounding tolerance.
    # NOTE: matmul inputs are bf16 (as the module casts to the trunk dtype); an f32
    # PyTorch Conv2d reference would agree only to ~1e-2 abs.
    out_bf16, _ = vision_prompt_learner_forward(
        x, params, patch_size=PATCH, n_vpro=N_VPRO)
    out_bf16 = jax.block_until_ready(out_bf16)
    assert out_bf16.dtype == jnp.bfloat16
    assert bool(jnp.all(jnp.isfinite(out_bf16.astype(jnp.float32))))
    err16 = float(jnp.max(jnp.abs(out_bf16.astype(jnp.float32) - ref)))
    assert err16 < 3e-2, err16

    print("KERNEL_OK")
</pallas_src>

<mosaic_0001>
module attributes {stable_mosaic.version = 11 : i64} {
  func.func @_prompt_embed_kernel(%arg0: i32, %arg1: memref<128x768xbf16, #tpu.memory_space<vmem>>, %arg2: memref<768x128xbf16, #tpu.memory_space<vmem>>, %arg3: memref<16x128xf32, #tpu.memory_space<vmem>>, %arg4: memref<1x128xf32, #tpu.memory_space<vmem>>, %arg5: memref<4x128xf32, #tpu.memory_space<vmem>>, %arg6: memref<8x21x128xf32, #tpu.memory_space<vmem>>) attributes {dimension_semantics = [#tpu.dimension_semantics<parallel>], iteration_bounds = array<i64: 4>, scalar_prefetch = 0 : i64, scratch_operands = 0 : i64, tpu.core_type = #tpu.core_type<tc>, window_params = [{transform_indices = @transform_0, window_bounds = array<i64: 128, 768>}, {pipeline_mode = #tpu.pipeline_mode<synchronous>, transform_indices = @transform_1, window_bounds = array<i64: 768, 128>}, {pipeline_mode = #tpu.pipeline_mode<synchronous>, transform_indices = @transform_2, window_bounds = array<i64: 16, 128>}, {pipeline_mode = #tpu.pipeline_mode<synchronous>, transform_indices = @transform_3, window_bounds = array<i64: 1, 128>}, {pipeline_mode = #tpu.pipeline_mode<synchronous>, transform_indices = @transform_4, window_bounds = array<i64: 4, 128>}, {transform_indices = @transform_5, window_bounds = array<i64: 8, 21, 128>}]} {
    %c0 = arith.constant 0 : index
    %c0_0 = arith.constant 0 : index
    %0 = vector.load %arg1[%c0, %c0_0] : memref<128x768xbf16, #tpu.memory_space<vmem>>, vector<128x768xbf16>
    %c0_1 = arith.constant 0 : index
    %c0_2 = arith.constant 0 : index
    %1 = vector.load %arg2[%c0_1, %c0_2] : memref<768x128xbf16, #tpu.memory_space<vmem>>, vector<768x128xbf16>
    %cst = arith.constant dense<0.000000e+00> : vector<128x128xf32>
    %2 = tpu.matmul %0, %1, %cst {dimension_numbers = #tpu.dot_dimension_numbers<[1], [0], [0], [1], [0, 0, 1, 1], [], []>} : vector<128x768xbf16>, vector<768x128xbf16>, vector<128x128xf32> -> vector<128x128xf32>
    %3 = vector.shape_cast %2 : vector<128x128xf32> to vector<8x16x128xf32>
    %c0_3 = arith.constant 0 : index
    %c0_4 = arith.constant 0 : index
    %4 = vector.load %arg3[%c0_3, %c0_4] : memref<16x128xf32, #tpu.memory_space<vmem>>, vector<16x128xf32>
    %5 = vector.shape_cast %4 : vector<16x128xf32> to vector<1x16x128xf32>
    %6 = vector.broadcast %5 : vector<1x16x128xf32> to vector<8x16x128xf32>
    %7 = arith.addf %3, %6 : vector<8x16x128xf32>
    %c0_5 = arith.constant 0 : index
    %c0_6 = arith.constant 0 : index
    %8 = vector.load %arg4[%c0_5, %c0_6] : memref<1x128xf32, #tpu.memory_space<vmem>>, vector<1x128xf32>
    %9 = vector.shape_cast %8 : vector<1x128xf32> to vector<1x1x128xf32>
    %10 = vector.shape_cast %9 : vector<1x1x128xf32> to vector<1x1x128xf32>
    %11 = vector.broadcast %10 : vector<1x1x128xf32> to vector<8x1x128xf32>
    %c0_7 = arith.constant 0 : index
    %c0_8 = arith.constant 0 : index
    %12 = vector.load %arg5[%c0_7, %c0_8] : memref<4x128xf32, #tpu.memory_space<vmem>>, vector<4x128xf32>
    %13 = vector.shape_cast %12 : vector<4x128xf32> to vector<1x4x128xf32>
    %14 = vector.shape_cast %13 : vector<1x4x128xf32> to vector<1x4x128xf32>
    %15 = vector.broadcast %14 : vector<1x4x128xf32> to vector<8x4x128xf32>
    %16 = tpu.concatenate %11, %7, %15 in 1 : vector<8x1x128xf32>, vector<8x16x128xf32>, vector<8x4x128xf32> -> vector<8x21x128xf32>
    %c0_9 = arith.constant 0 : index
    %c0_10 = arith.constant 0 : index
    %c0_11 = arith.constant 0 : index
    %17 = vector.load %arg6[%c0_9, %c0_10, %c0_11] : memref<8x21x128xf32, #tpu.memory_space<vmem>>, vector<8x21x128xf32>
    tpu.vector_store %arg6[%c0_9, %c0_10, %c0_11], %16 {strides = array<i32>} : memref<8x21x128xf32, #tpu.memory_space<vmem>>, vector<8x21x128xf32>,
    return
  }
  func.func @transform_0(%arg0: i32) -> (i32, i32) {
    %c0_i32 = arith.constant 0 : i32
    %c0_i32_0 = arith.constant 0 : i32
    return %arg0, %c0_i32 : i32, i32
  }
  func.func @transform_1(%arg0: i32) -> (i32, i32) {
    %c0_i32 = arith.constant 0 : i32
    %c0_i32_0 = arith.constant 0 : i32
    %c0_i32_1 = arith.constant 0 : i32
    return %c0_i32, %c0_i32_0 : i32, i32
  }
  func.func @transform_2(%arg0: i32) -> (i32, i32) {
    %c0_i32 = arith.constant 0 : i32
    %c0_i32_0 = arith.constant 0 : i32
    %c0_i32_1 = arith.constant 0 : i32
    return %c0_i32, %c0_i32_0 : i32, i32
  }
  func.func @transform_3(%arg0: i32) -> (i32, i32) {
    %c0_i32 = arith.constant 0 : i32
    %c0_i32_0 = arith.constant 0 : i32
    %c0_i32_1 = arith.constant 0 : i32
    return %c0_i32, %c0_i32_0 : i32, i32
  }
  func.func @transform_4(%arg0: i32) -> (i32, i32) {
    %c0_i32 = arith.constant 0 : i32
    %c0_i32_0 = arith.constant 0 : i32
    %c0_i32_1 = arith.constant 0 : i32
    return %c0_i32, %c0_i32_0 : i32, i32
  }
  func.func @transform_5(%arg0: i32) -> (i32, i32, i32) {
    %c0_i32 = arith.constant 0 : i32
    %c0_i32_0 = arith.constant 0 : i32
    %c0_i32_1 = arith.constant 0 : i32
    return %arg0, %c0_i32, %c0_i32_0 : i32, i32, i32
  }
}

</mosaic_0001>

<bundles_post_ra>
// kernel: tpu_custom_call.1
= control target key start
LH: loop header
LB: loop body
LE: loop exit
PB: predicated region body
PF: predicated region fallthrough
CT: control target
= control target key end

     0   :  { %10 = vsyncpa [#allocation3], 0  ;;  %s2500_s0 = inlined_call_operand.hbm [shape: bf16[512,768], index: 0, kind: input, shape index: {}]   ;;  %s2501_s1 = inlined_call_operand.hbm [shape: bf16[768,128], index: 1, kind: input, shape index: {}]   ;;  %s2502_s2 = inlined_call_operand.hbm [shape: f32[16,128], index: 2, kind: input, shape index: {}]   ;;  %s2503_s3 = inlined_call_operand.vmem [shape: f32[1,128], index: 3, kind: input, shape index: {}]   ;;  %s2504_s4 = inlined_call_operand.vmem [shape: f32[4,128], index: 4, kind: input, shape index: {}]   ;;  %s2505_s5 = inlined_call_operand.vmem [shape: f32[32,21,128], index: 5, kind: output, shape index: {}]  }
   0x1   :  { %12 = vsyncpa [#allocation3 + $0x1], 0 }
   0x2   :  { %13 = vsyncpa [#allocation5], 0  ;;  %s2134_s18 = smov 0   ;;  %s2136_s19 = smov 0  }
   0x3   :  { %s2138_s20 = smov 0   ;;  %s2140_s21 = smov 0  }
   0x4 LB: > { %s1459_s22 = sadd.s32 4294967295, %s2093_s21   ;;  %p39_p0 = scmp.ne.s32.totalorder %s2085_s19, %s2081_s18  ;;  %s2093_s21 = sphi %s2140_s21, %s2521_s21   ;;  %s2089_s20 = sphi %s2138_s20, %s2520_s20   ;;  %s2085_s19 = sphi %s2136_s19, %s2519_s19   ;;  %s2081_s18 = sphi %s2134_s18, %s2518_s18  }
   0x5   : > { %p2156_p1 = scmp.eq.s32.totalorder %s1459_s22, 0  ;;  %p1461_p2 = scmp.ge.s32.totalorder %s2093_s21, 1 }
   0x6   : > { %p160_p3 = scmp.lt.s32.totalorder %s2093_s21, 5  ;;  %s2095_s26 = smov [#allocation4]  }
   0x7   : > { %s2510_s23 = scalar_select %p2156_p1, 1, 0 }
   0x8   : > { %p2164_p4 = por %p2156_p1, %p39_p0  ;;  %p2168_p5 = pnand %p1461_p2, %p160_p3 }
   0x9   : > { %s172_s27 = sshll.u32 %s2095_s26, 4  ;;  %s2096_s29 = smov [#allocation6]   ;;  %s173_s27 = int_to_ptr.vmem [resolvable:$true] %s172_s27 }
   0xa   : > { %s2511_s24 = scalar_select %p2164_p4, 1, 0 }
   0xb   : > { %s2512_s25 = scalar_select %p2168_p5, 1, 0 }
   0xc   : > { %p1793_p6 = pneg %p2168_p5  ;;  %s185_s30 = sshll.u32 %s2096_s29, 4  ;;  %s2180_s30 = int_to_ptr.vmem [resolvable:$true] %s185_s30 }
   0xd   : > { %s1969_s8 = scalar_lea.hbm %s2501_s1, 6144 }
   0xe   : > { %p2176_p7 = pnand %p1793_p6, %p2156_p1  ;;  %p1970_p8 = scmp.ne.s32.totalorder %s2501_s1, %s1969_s8 }
   0xf   : > { %p1976_p12 = scmp.lt.u32.totalorder %s1969_s8, %s2501_s1 }
  0x10   : > { %p1971_p9 = pneg %p2176_p7 }
  0x12   : > { %p1972_p10 = pnand %p1971_p9, %p1970_p8 }
  0x14   : > { %p1973_p11 = pneg %p1972_p10 }
  0x16   : > { %p1978_p13 = pnand %p1976_p12, %p1973_p11 }
  0x18   : > { %1981 = shalt.err (!%p1978_p13)
}
  0x19   : > { %s1982_s13 = scalar_lea.vmem %s173_s27, 6144  ;;  %p1990_p6 = scmp.lt.s32.totalorder %s173_s27, %s173_s27 }
  0x1a   : > { %p1983_p0 = scmp.ne.s32.totalorder %s173_s27, %s1982_s13  ;;  %p1991_p1 = scmp.lt.s32.totalorder %s1982_s13, %s1982_s13 }
  0x1c   : > { %p1985_p2 = pnand %p1983_p0, %p1971_p9  ;;  %p1992_p4 = por %p1991_p1, %p1990_p6 }
  0x1e   : > { %p1986_p3 = pneg %p1985_p2 }
  0x20   : > { %p1993_p5 = pnand %p1992_p4, %p1986_p3 }
  0x22   : > { %1996 = shalt.err (!%p1993_p5)
}
  0x23   : > { %s2097_s14 = smov 64   ;;  %s2098_s15 = smov 4  }
  0x24   : > { %1796 = dma.hbm_to_vmem [thread:$0]  (!%p2176_p7), %s2501_s1, 6144, %s173_s27, [#allocation5], %s2097_s14, %s2097_s14, %s2098_s15  }
  0x25   : > { %s1997_s29 = scalar_lea.hbm %s2502_s2, 256 }
  0x26   : > { %p1998_p8 = scmp.ne.s32.totalorder %s2502_s2, %s1997_s29  ;;  %p2004_p5 = scmp.lt.u32.totalorder %s1997_s29, %s2502_s2 }
  0x28   : > { %p2000_p1 = pnand %p1998_p8, %p1971_p9 }
  0x2a   : > { %p2001_p4 = pneg %p2000_p1 }
  0x2c   : > { %p2006_p10 = pnand %p2004_p5, %p2001_p4 }
  0x2e   : > { %2009 = shalt.err (!%p2006_p10)
}
  0x2f   : > { %s2010_s27 = scalar_lea.vmem %s2180_s30, 256  ;;  %p2018_p0 = scmp.lt.s32.totalorder %s2180_s30, %s2180_s30 }
  0x30   : > { %p2011_p11 = scmp.ne.s32.totalorder %s2180_s30, %s2010_s27  ;;  %p2019_p2 = scmp.lt.s32.totalorder %s2010_s27, %s2010_s27 }
  0x32   : > { %p2013_p12 = pnand %p2011_p11, %p1971_p9  ;;  %p2020_p3 = por %p2019_p2, %p2018_p0 }
  0x34   : > { %p2014_p13 = pneg %p2013_p12 }
  0x36   : > { %p2021_p6 = pnand %p2020_p3, %p2014_p13 }
  0x38   : > { %2024 = shalt.err (!%p2021_p6)
}
  0x39   : > { %s2099_s10 = smov 128   ;;  %s2100_s11 = smov 8  }
  0x3a   : > { %1799 = dma.hbm_to_vmem [thread:$0]  (!%p2176_p7), %s2502_s2, 256, %s2180_s30, [#allocation5], %s2099_s10, %s2099_s10, %s2100_s11  }
  0x3b   : > { %s2230_s14 = sadd.s32 1, %s2093_s21   ;;  %s26_s16 = sadd.s32 1, %s2089_s20 }
  0x3c   : > { %s23_s15 = ssub.s32 %s2093_s21, %s2230_s14  ;;  %p33_p8 = scmp.ne.s32.totalorder %s2089_s20, %s2085_s19 }
  0x3d   : > { %p24_p9 = scmp.eq.s32.totalorder %s23_s15, 0  ;;  %p34_p1 = scmp.eq.s32.totalorder %s2093_s21, 0 }
  0x3e   : > { %p1806_p5 = scmp.lt.s32.totalorder %s2093_s21, 4  ;;  %s205_s18 = sand.u32 1, %s2089_s20  }
  0x3f   : > { %s2239_s17 = scalar_select %p24_p9, %s2089_s20, %s26_s16  }
  0x40   : > { %p35_p4 = por %p34_p1, %p33_p8  ;;  %s1780_s26 = smul.u32 6144, %s2093_s21 }
  0x41   : > { %s1779_s29 = smul.u32 384, %s205_s18  ;;  %s2255_s27 = scalar_lea.sflag [#allocation3], %s205_s18 }
  0x42   : > { %s2247_s7 = scalar_lea.hbm %s2500_s0, %s1780_s26  ;;  %p2249_p7 = pnand %p1806_p5, %p35_p4 }
  0x43   : > { %s209_s8 = scalar_lea.vmem [#allocation2], %s1779_s29  ;;  %s2025_s10 = scalar_lea.hbm %s2247_s7, 6144 }
  0x44   : > { %s217_s9 = sshll.u32 %s209_s8, 4  ;;  %p2026_p10 = scmp.ne.s32.totalorder %s2247_s7, %s2025_s10  ;;  %s2253_s9 = int_to_ptr.vmem [resolvable:$true] %s217_s9 }
  0x45   : > { %p2027_p11 = pneg %p2249_p7  ;;  %s2030_s13 = scalar_lea.hbm %s2500_s0, 24576 }
  0x46   : > { %p2031_p0 = scmp.lt.u32.totalorder %s2247_s7, %s2500_s0  ;;  %p2032_p2 = scmp.lt.u32.totalorder %s2030_s13, %s2025_s10 }
  0x47   : > { %p2028_p12 = pnand %p2027_p11, %p2026_p10  ;;  %p2034_p6 = scmp.lt.u32.totalorder %s2025_s10, %s2247_s7 }
  0x48   : > { %p2033_p3 = por %p2032_p2, %p2031_p0 }
  0x49   : > { %p2029_p13 = pneg %p2028_p12 }
  0x4a   : > { %p2035_p9 = por %p2034_p6, %p2033_p3 }
  0x4c   : > { %p2036_p8 = pnand %p2035_p9, %p2029_p13 }
  0x4e   : > { %2039 = shalt.err (!%p2036_p8)
}
  0x4f   : > { %s2040_s18 = scalar_lea.vmem %s2253_s9, 6144  ;;  %s2101_s26 = smov [#allocation2]  }
  0x50   : > { %p2041_p1 = scmp.ne.s32.totalorder %s2253_s9, %s2040_s18  ;;  %s2045_s29 = sshll.u32 %s2101_s26, 4  ;;  %s2046_s29 = int_to_ptr.vmem [resolvable:$false] %s2045_s29 }
  0x51   : > { %s2047_s28 = scalar_lea.vmem %s2046_s29, 12288  ;;  %p2048_p10 = scmp.lt.s32.totalorder %s2253_s9, %s2046_s29 }
  0x52   : > { %p2043_p4 = pnand %p2041_p1, %p2027_p11  ;;  %p2049_p12 = scmp.lt.s32.totalorder %s2047_s28, %s2040_s18 }
  0x54   : > { %p2044_p5 = pneg %p2043_p4  ;;  %p2050_p0 = por %p2049_p12, %p2048_p10 }
  0x56   : > { %p2051_p2 = pnand %p2050_p0, %p2044_p5 }
  0x58   : > { %2054 = shalt.err (!%p2051_p2)
}
  0x59   : > { %s2102_s6 = smov 384   ;;  %s2103_s8 = smov 24  }
  0x5a   : > { %1803 = dma.hbm_to_vmem [thread:$0]  (!%p2249_p7), %s2247_s7, 6144, %s2253_s9, %s2255_s27, %s2102_s6, %s2102_s6, %s2103_s8  }
  0x5b   : > { %p2515_p11 = scmp.ne.s32.totalorder %s2512_s25, 0 }
  0x5c   : > { %s231_s10 = sand.u32 (!%p2515_p11), 1, %s2085_s19   ;;  %p2516_p13 = scmp.ne.s32.totalorder (!%p2515_p11), %s2511_s24, 0 }
  0x5d   : > { %229 = sbr.rel (%p2515_p11) target bundleno = 452 (0x1c4), region = 40  ;;  %s232_s12 = scalar_lea.sflag (!%p2515_p11), [#allocation3], %s231_s10 }
  0x5e   : > { %s1781_s11 = smul.u32 (!%p2515_p11), 384, %s231_s10 }
  0x60   : > { %s2286_s13 = scalar_lea.vmem (!%p2515_p11), [#allocation2], %s1781_s11 }
  0x64   : > { %2072 = dma.done.wait (%p2516_p13), %s232_s12, 6144  }
  0x65   : > { %2074 = vsyncadd (%p2516_p13), %s232_s12, 4294961152  ;;  %p2517_p3 = scmp.ne.s32.totalorder %s2510_s23, 0 }
  0x67   : > { %2076 = dma.done.wait (%p2517_p3), [#allocation5], 6400  }
  0x68   : > { %2078 = vsyncadd (%p2517_p3), [#allocation5], 4294960896  ;;  %v1849_v0 = vld [vmem:[#allocation4 + $0x40] sm:$0xff]   ;;  %v1851_v2 = vld [vmem:[#allocation4 + $0x48] sm:$0xff]   ;;  %s1471_s23 = sshll.u32 %s1459_s22, 3  ;;  %vm1279_vm0 = vcmask 1040384  }
  0x69   : > { %v1850_v1 = vld [vmem:[#allocation4] sm:$0xff]   ;;  %1571 = vmatprep.subr.bf16.mxu0 %v1849_v0  ;;  %1763 = vmatprep.subr.bf16.mxu1 %v1849_v0  ;;  %v1852_v3 = vld [vmem:[#allocation4 + $0x8] sm:$0xff]   ;;  %v1853_v4 = vld [vmem:[#allocation4 + $0x50] sm:$0xff]   ;;  %p273_p7 = scmp.lt.s32.totalorder %s1471_s23, 31 }
  0x6a   : > { %1572 = vmatpush3.bf16.msra.mxu0 %v1850_v1  ;;  %1771 = vmatpush3.bf16.msra.mxu1 %v1850_v1  ;;  %v1854_v5 = vld [vmem:[#allocation4 + $0x10] sm:$0xff]   ;;  %v1855_v6 = vld [vmem:[#allocation4 + $0x58] sm:$0xff]   ;;  %v1857_v8 = vld [vmem:[#allocation4 + $0x60] sm:$0xff]  }
  0x6b   : > { %1573 = vmatprep.subr.bf16.mxu0 %v1851_v2  ;;  %1764 = vmatprep.subr.bf16.mxu1 %v1851_v2  ;;  %v1856_v7 = vld [vmem:[#allocation4 + $0x18] sm:$0xff]   ;;  %v1858_v9 = vld [vmem:[#allocation4 + $0x20] sm:$0xff]   ;;  %v1859_v10 = vld [vmem:[#allocation4 + $0x68] sm:$0xff]   ;;  %s2523_s23 = smov (!%p273_p7, %s1471_s23), 31 }
  0x6c   : > { %v1867_v11 = vld [vmem:[%s2286_s13 + $0x4] ss:$24 sps:$4 sm:$0xff]   ;;  %v1860_v13 = vld [vmem:[#allocation4 + $0x28] sm:$0xff]   ;;  %v1861_v14 = vld [vmem:[#allocation4 + $0x70] sm:$0xff]   ;;  %s1782_s21 = smul.u32 24, %s2523_s23 }
  0x6d   : > { %v1870_v12 = vld [vmem:[%s2286_s13 + $0xc4] ss:$24 sps:$4 sm:$0xff]   ;;  %984 = vmatprep.mubr.bf16.mxu0 %v1867_v11  ;;  %v1862_v15 = vld [vmem:[#allocation4 + $0x30] sm:$0xff]   ;;  %v1865_v18 = vld [vmem:[%s2286_s13] ss:$24 sps:$4 sm:$0xff]  }
  0x6e   : > { %1574 = vmatpush3.bf16.msra.mxu0 %v1852_v3  ;;  %1772 = vmatpush3.bf16.msra.mxu1 %v1852_v3  ;;  %v1863_v16 = vld [vmem:[#allocation4 + $0x78] sm:$0xff]   ;;  %v1871_v20 = vld [vmem:[#allocation4 + $0xc0] sm:$0xff]   ;;  %v1875_v24 = vld [vmem:[#allocation4 + $0xc8] sm:$0xff]   ;;  %s2392_s27 = scalar_lea.vmem %s2505_s5, %s1782_s21 }
  0x6f   : > { %1575 = vmatprep.subr.bf16.mxu0 %v1853_v4  ;;  %1765 = vmatprep.subr.bf16.mxu1 %v1853_v4  ;;  %v1864_v17 = vld [vmem:[#allocation4 + $0x38] sm:$0xff]   ;;  %v1872_v21 = vld [vmem:[#allocation4 + $0x140] sm:$0xff]   ;;  %v1876_v25 = vld [vmem:[#allocation4 + $0x148] sm:$0xff]  }
  0x70   : > { %1016 = vmatprep.mubr.bf16.mxu1 %v1870_v12  ;;  %v1868_v19 = vld [vmem:[%s2286_s13 + $0xc0] ss:$24 sps:$4 sm:$0xff]   ;;  %v1879_v26 = vld [vmem:[%s2286_s13 + $0x34] ss:$24 sps:$4 sm:$0xff]   ;;  %v1883_v31 = vld [vmem:[%s2286_s13 + $0x30] ss:$24 sps:$4 sm:$0xff]  }
  0x71   : > { %v1873_v22 = vld [vmem:[#allocation4 + $0x80] sm:$0xff]   ;;  %v1877_v27 = vld [vmem:[#allocation4 + $0x88] sm:$0xff]   ;;  %v1885_v30 = vld [vmem:[#allocation4 + $0xd0] sm:$0xff]  }
  0x72   : > { %1576 = vmatpush3.bf16.msra.mxu0 %v1854_v5  ;;  %1773 = vmatpush3.bf16.msra.mxu1 %v1854_v5  ;;  %v1874_v23 = vld [vmem:[#allocation4 + $0x100] sm:$0xff]   ;;  %v1881_v28 = vld [vmem:[%s2286_s13 + $0xf4] ss:$24 sps:$4 sm:$0xff]   ;;  %v1884_v33 = vld [vmem:[%s2286_s13 + $0xf0] ss:$24 sps:$4 sm:$0xff]  }
  0x73   : > { %1577 = vmatprep.subr.bf16.mxu0 %v1855_v6  ;;  %1766 = vmatprep.subr.bf16.mxu1 %v1855_v6  ;;  %v1878_v29 = vld [vmem:[#allocation4 + $0x108] sm:$0xff]   ;;  %v1886_v32 = vld [vmem:[#allocation4 + $0x150] sm:$0xff]   ;;  %v1889_v36 = vld [vmem:[#allocation4 + $0xd8] sm:$0xff]  }
  0x74   : > { %v1887_v34 = vld [vmem:[#allocation4 + $0x90] sm:$0xff]   ;;  %v1890_v37 = vld [vmem:[#allocation4 + $0x158] sm:$0xff]   ;;  %v1899_v42 = vld [vmem:[#allocation4 + $0xe0] sm:$0xff]  }
  0x75   : > { %v1888_v35 = vld [vmem:[#allocation4 + $0x110] sm:$0xff]   ;;  %v1893_v38 = vld [vmem:[%s2286_s13 + $0x64] ss:$24 sps:$4 sm:$0xff]   ;;  %v1897_v43 = vld [vmem:[%s2286_s13 + $0x60] ss:$24 sps:$4 sm:$0xff]  }
  0x76   : > { %1578 = vmatpush3.bf16.msra.mxu0 %v1856_v7  ;;  %1774 = vmatpush3.bf16.msra.mxu1 %v1856_v7  ;;  %v1891_v39 = vld [vmem:[#allocation4 + $0x98] sm:$0xff]   ;;  %v1900_v45 = vld [vmem:[#allocation4 + $0x160] sm:$0xff]   ;;  %v1903_v48 = vld [vmem:[#allocation4 + $0xe8] sm:$0xff]  }
  0x77   : > { %1579 = vmatprep.subr.bf16.mxu0 %v1857_v8  ;;  %1767 = vmatprep.subr.bf16.mxu1 %v1857_v8  ;;  %v1895_v40 = vld [vmem:[%s2286_s13 + $0x124] ss:$24 sps:$4 sm:$0xff]   ;;  %v1898_v44 = vld [vmem:[%s2286_s13 + $0x120] ss:$24 sps:$4 sm:$0xff]   ;;  %v1904_v49 = vld [vmem:[#allocation4 + $0x168] sm:$0xff]  }
  0x78   : > { %v1892_v41 = vld [vmem:[#allocation4 + $0x118] sm:$0xff]   ;;  %v1901_v46 = vld [vmem:[#allocation4 + $0xa0] sm:$0xff]   ;;  %v1907_v50 = vld [vmem:[%s2286_s13 + $0x94] ss:$24 sps:$4 sm:$0xff]  }
  0x79   : > { %v1902_v47 = vld [vmem:[#allocation4 + $0x120] sm:$0xff]   ;;  %v1909_v51 = vld [vmem:[%s2286_s13 + $0x154] ss:$24 sps:$4 sm:$0xff]   ;;  %v1911_v55 = vld [vmem:[%s2286_s13 + $0x90] ss:$24 sps:$4 sm:$0xff]  }
  0x7a   : > { %1580 = vmatpush3.bf16.msra.mxu0 %v1858_v9  ;;  %1775 = vmatpush3.bf16.msra.mxu1 %v1858_v9  ;;  %v1905_v52 = vld [vmem:[#allocation4 + $0xa8] sm:$0xff]   ;;  %v1913_v54 = vld [vmem:[#allocation4 + $0xf0] sm:$0xff]   ;;  %v1917_v60 = vld [vmem:[#allocation4 + $0xf8] sm:$0xff]  }
  0x7b   : > { %1581 = vmatprep.subr.bf16.mxu0 %v1859_v10  ;;  %1768 = vmatprep.subr.bf16.mxu1 %v1859_v10  ;;  %v1906_v53 = vld [vmem:[#allocation4 + $0x128] sm:$0xff]   ;;  %v1914_v57 = vld [vmem:[#allocation4 + $0x170] sm:$0xff]   ;;  %v1918_v61 = vld [vmem:[#allocation4 + $0x178] sm:$0xff]  }
  0x7c   : > { %v1912_v56 = vld [vmem:[%s2286_s13 + $0x150] ss:$24 sps:$4 sm:$0xff]   ;;  %v1919_v62 = vld [vmem:[#allocation4 + $0xb8] sm:$0xff]   ;;  %v1923_v0 = vld [vmem:[%s2286_s13 + $0xc] ss:$24 sps:$4 sm:$0xff]  }
  0x7d   : > { %v1915_v58 = vld [vmem:[#allocation4 + $0xb0] sm:$0xff]   ;;  %v1920_v63 = vld [vmem:[#allocation4 + $0x138] sm:$0xff]   ;;  %v1921_v1 = vld [vmem:[%s2286_s13 + $0x8] ss:$24 sps:$4 sm:$0xff]  }
  0x7e   : > { %1582 = vmatpush3.bf16.msra.mxu0 %v1860_v13  ;;  %1776 = vmatpush3.bf16.msra.mxu1 %v1860_v13  ;;  %v1916_v59 = vld [vmem:[#allocation4 + $0x130] sm:$0xff]   ;;  %v1929_v5 = vld [vmem:[%s2286_s13 + $0x44] ss:$24 sps:$4 sm:$0xff]   ;;  %v1932_v7 = vld [vmem:[%s2286_s13 + $0x40] ss:$24 sps:$4 sm:$0xff]  }
  0x7f   : > { %1583 = vmatprep.subr.bf16.mxu0 %v1861_v14  ;;  %1769 = vmatprep.subr.bf16.mxu1 %v1861_v14  ;;  %v1926_v2 = vld [vmem:[%s2286_s13 + $0x14] ss:$24 sps:$4 sm:$0xff]   ;;  %v1924_v3 = vld [vmem:[%s2286_s13 + $0x10] ss:$24 sps:$4 sm:$0xff]   ;;  %v1941_v13 = vld [vmem:[%s2286_s13 + $0xa4] ss:$24 sps:$4 sm:$0xff]  }
  0x80   : > { %v1927_v4 = vld [vmem:[%s2286_s13 + $0x3c] ss:$24 sps:$4 sm:$0xff]   ;;  %v1931_v6 = vld [vmem:[%s2286_s13 + $0x38] ss:$24 sps:$4 sm:$0xff]   ;;  %v1933_v8 = vld [vmem:[%s2286_s13 + $0x6c] ss:$24 sps:$4 sm:$0xff]  }
  0x81   : > { %v1935_v9 = vld [vmem:[%s2286_s13 + $0x74] ss:$24 sps:$4 sm:$0xff]   ;;  %v1937_v10 = vld [vmem:[%s2286_s13 + $0x68] ss:$24 sps:$4 sm:$0xff]   ;;  %v1943_v14 = vld [vmem:[%s2286_s13 + $0x98] ss:$24 sps:$4 sm:$0xff]  }
  0x82   : > { %1584 = vmatpush3.bf16.msra.mxu0 %v1862_v15  ;;  %1777 = vmatpush3.bf16.msra.mxu1 %v1862_v15  ;;  %v1938_v11 = vld [vmem:[%s2286_s13 + $0x70] ss:$24 sps:$4 sm:$0xff]   ;;  %v1939_v12 = vld [vmem:[%s2286_s13 + $0x9c] ss:$24 sps:$4 sm:$0xff]   ;;  %v1944_v15 = vld [vmem:[%s2286_s13 + $0xa0] ss:$24 sps:$4 sm:$0xff]  }
  0x83   : > { %1585 = vmatprep.subr.bf16.mxu0 %v1863_v16  ;;  %1770 = vmatprep.subr.bf16.mxu1 %v1863_v16  ;;  %v1945_v16 = vld [vmem:[%s2286_s13 + $0xcc] ss:$24 sps:$4 sm:$0xff]  }
  0x86   : > { %1586 = vmatpush3.bf16.msra.mxu0 %v1864_v17  ;;  %1778 = vmatpush3.bf16.msra.mxu1 %v1864_v17  ;;  %v1947_v17 = vld [vmem:[%s2286_s13 + $0xd4] ss:$24 sps:$4 sm:$0xff]  }
  0x87   : > { %1635 = vmatprep.subr.bf16.mxu1 %v1871_v20  ;;  %1699 = vmatprep.subr.bf16.mxu0 %v1872_v21  ;;  %v1951_v20 = vld [vmem:[%s2286_s13 + $0xfc] ss:$24 sps:$4 sm:$0xff]  }
  0x88   : > { %v1953_v21 = vld [vmem:[%s2286_s13 + $0x104] ss:$24 sps:$4 sm:$0xff]  }
  0x89   : > { %985 = vmatmul.mubr.bf16.vlgmr.msra.gmra.mrb[0].mxu0 %v1865_v18  ;;  %1017 = vmatmul.mubr.bf16.vlgmr.msra.gmra.mrb[0].mxu1 %v1868_v19  ;;  %v1949_v18 = vld [vmem:[%s2286_s13 + $0xc8] ss:$24 sps:$4 sm:$0xff]  }
  0x8a   : > { %1636 = vmatpush3.bf16.msra.mxu1 %v1873_v22  ;;  %1700 = vmatpush3.bf16.msra.mxu0 %v1874_v23  ;;  %v1950_v19 = vld [vmem:[%s2286_s13 + $0xd0] ss:$24 sps:$4 sm:$0xff]   ;;  %v1956_v23 = vld [vmem:[%s2286_s13 + $0x100] ss:$24 sps:$4 sm:$0xff]  }
  0x8b   : > { %1637 = vmatprep.subr.bf16.mxu1 %v1875_v24  ;;  %1701 = vmatprep.subr.bf16.mxu0 %v1876_v25  ;;  %v1955_v22 = vld [vmem:[%s2286_s13 + $0xf8] ss:$24 sps:$4 sm:$0xff]   ;;  %v1957_v24 = vld [vmem:[%s2286_s13 + $0x12c] ss:$24 sps:$4 sm:$0xff]  }
  0x8c   : > { %992 = vmatprep.mubr.bf16.mxu0 %v1879_v26  ;;  %1024 = vmatprep.mubr.bf16.mxu1 %v1881_v28  ;;  %v1959_v25 = vld [vmem:[%s2286_s13 + $0x134] ss:$24 sps:$4 sm:$0xff]   ;;  %v1961_v26 = vld [vmem:[%s2286_s13 + $0x128] ss:$24 sps:$4 sm:$0xff]  }
  0x8d   : > { %v1963_v28 = vld [vmem:[%s2286_s13 + $0x15c] ss:$24 sps:$4 sm:$0xff]  }
  0x8e   : > { %1638 = vmatpush3.bf16.msra.mxu1 %v1877_v27  ;;  %1702 = vmatpush3.bf16.msra.mxu0 %v1878_v29  ;;  %v1962_v27 = vld [vmem:[%s2286_s13 + $0x130] ss:$24 sps:$4 sm:$0xff]   ;;  %v1965_v29 = vld [vmem:[%s2286_s13 + $0x164] ss:$24 sps:$4 sm:$0xff]  }
  0x8f   : > { %1639 = vmatprep.subr.bf16.mxu1 %v1885_v30  ;;  %1703 = vmatprep.subr.bf16.mxu0 %v1886_v32  ;;  %v1967_v30 = vld [vmem:[%s2286_s13 + $0x158] ss:$24 sps:$4 sm:$0xff]  }
  0x91   : > { %993 = vmatmul.mubr.bf16.gmra.mrb[4].mxu0 %v1883_v31  ;;  %1025 = vmatmul.mubr.bf16.gmra.mrb[4].mxu1 %v1884_v33  ;;  %v1968_v31 = vld [vmem:[%s2286_s13 + $0x160] ss:$24 sps:$4 sm:$0xff]  }
  0x92   : > { %1640 = vmatpush3.bf16.msra.mxu1 %v1887_v34  ;;  %1704 = vmatpush3.bf16.msra.mxu0 %v1888_v35 }
  0x93   : > { %1641 = vmatprep.subr.bf16.mxu1 %v1889_v36  ;;  %1705 = vmatprep.subr.bf16.mxu0 %v1890_v37 }
  0x94   : > { %1000 = vmatprep.mubr.bf16.mxu0 %v1893_v38  ;;  %1032 = vmatprep.mubr.bf16.mxu1 %v1895_v40 }
  0x96   : > { %1642 = vmatpush3.bf16.msra.mxu1 %v1891_v39  ;;  %1706 = vmatpush3.bf16.msra.mxu0 %v1892_v41 }
  0x97   : > { %1643 = vmatprep.subr.bf16.mxu1 %v1899_v42  ;;  %1707 = vmatprep.subr.bf16.mxu0 %v1900_v45 }
  0x99   : > { %1001 = vmatmul.mubr.bf16.gmra.mrb[8].mxu0 %v1897_v43  ;;  %1033 = vmatmul.mubr.bf16.gmra.mrb[8].mxu1 %v1898_v44 }
  0x9a   : > { %1644 = vmatpush3.bf16.msra.mxu1 %v1901_v46  ;;  %1708 = vmatpush3.bf16.msra.mxu0 %v1902_v47 }
  0x9b   : > { %1645 = vmatprep.subr.bf16.mxu1 %v1903_v48  ;;  %1709 = vmatprep.subr.bf16.mxu0 %v1904_v49 }
  0x9c   : > { %1008 = vmatprep.mubr.bf16.mxu0 %v1907_v50  ;;  %1040 = vmatprep.mubr.bf16.mxu1 %v1909_v51 }
  0x9e   : > { %1646 = vmatpush3.bf16.msra.mxu1 %v1905_v52  ;;  %1710 = vmatpush3.bf16.msra.mxu0 %v1906_v53 }
  0x9f   : > { %1647 = vmatprep.subr.bf16.mxu1 %v1913_v54  ;;  %1711 = vmatprep.subr.bf16.mxu0 %v1914_v57 }
  0xa1   : > { %1009 = vmatmul.mubr.bf16.gmra.mrb[12].mxu0 %v1911_v55  ;;  %1041 = vmatmul.mubr.bf16.gmra.mrb[12].mxu1 %v1912_v56 }
  0xa2   : > { %1648 = vmatpush3.bf16.msra.mxu1 %v1915_v58  ;;  %1712 = vmatpush3.bf16.msra.mxu0 %v1916_v59 }
  0xa3   : > { %1649 = vmatprep.subr.bf16.mxu1 %v1917_v60  ;;  %1713 = vmatprep.subr.bf16.mxu0 %v1918_v61 }
  0xa4   : > { %1081 = vmatprep.mubr.bf16.mxu1 %v1923_v0  ;;  %1178 = vmatprep.mubr.bf16.mxu0 %v1926_v2 }
  0xa6   : > { %1650 = vmatpush3.bf16.msra.mxu1 %v1919_v62  ;;  %1714 = vmatpush3.bf16.msra.mxu0 %v1920_v63 }
  0xa9   : > { %1082 = vmatmul.mubr.bf16.vlgmr.msra.gmra.mrb[16].mxu1 %v1921_v1  ;;  %1179 = vmatmul.mubr.bf16.vlgmr.msra.gmra.mrb[16].mxu0 %v1924_v3 }
  0xaa   : > { %1089 = vmatprep.mubr.bf16.mxu1 %v1927_v4  ;;  %1186 = vmatprep.mubr.bf16.mxu0 %v1929_v5 }
  0xb1   : > { %1090 = vmatmul.mubr.bf16.gmra.mrb[20].mxu1 %v1931_v6  ;;  %1187 = vmatmul.mubr.bf16.gmra.mrb[20].mxu0 %v1932_v7 }
  0xb2   : > { %1097 = vmatprep.mubr.bf16.mxu1 %v1933_v8  ;;  %1194 = vmatprep.mubr.bf16.mxu0 %v1935_v9 }
  0xb9   : > { %1098 = vmatmul.mubr.bf16.gmra.mrb[24].mxu1 %v1937_v10  ;;  %1195 = vmatmul.mubr.bf16.gmra.mrb[24].mxu0 %v1938_v11 }
  0xba   : > { %1105 = vmatprep.mubr.bf16.mxu1 %v1939_v12  ;;  %1202 = vmatprep.mubr.bf16.mxu0 %v1941_v13 }
  0xc1   : > { %1106 = vmatmul.mubr.bf16.gmra.mrb[28].mxu1 %v1943_v14  ;;  %1203 = vmatmul.mubr.bf16.gmra.mrb[28].mxu0 %v1944_v15 }
  0xc2   : > { %1113 = vmatprep.mubr.bf16.mxu1 %v1945_v16  ;;  %1210 = vmatprep.mubr.bf16.mxu0 %v1947_v17 }
  0xc9   : > { %1114 = vmatmul.mubr.bf16.gmra.mrb[32].mxu1 %v1949_v18  ;;  %1211 = vmatmul.mubr.bf16.gmra.mrb[32].mxu0 %v1950_v19 }
  0xca   : > { %1121 = vmatprep.mubr.bf16.mxu1 %v1951_v20  ;;  %1218 = vmatprep.mubr.bf16.mxu0 %v1953_v21 }
  0xd1   : > { %1122 = vmatmul.mubr.bf16.gmra.mrb[36].mxu1 %v1955_v22  ;;  %1219 = vmatmul.mubr.bf16.gmra.mrb[36].mxu0 %v1956_v23 }
  0xd2   : > { %1129 = vmatprep.mubr.bf16.mxu1 %v1957_v24  ;;  %1226 = vmatprep.mubr.bf16.mxu0 %v1959_v25 }
  0xd9   : > { %1130 = vmatmul.mubr.bf16.gmra.mrb[40].mxu1 %v1961_v26  ;;  %1227 = vmatmul.mubr.bf16.gmra.mrb[40].mxu0 %v1962_v27 }
  0xda   : > { %1137 = vmatprep.mubr.bf16.mxu1 %v1963_v28  ;;  %1234 = vmatprep.mubr.bf16.mxu0 %v1965_v29  ;;  %v2374_v29 = vld [vmem:[#allocation6] sm:$0xff] }
  0xe1   : > { %1138 = vmatmul.mubr.bf16.gmra.mrb[44].mxu1 %v1967_v30  ;;  %1235 = vmatmul.mubr.bf16.gmra.mrb[44].mxu0 %v1968_v31 }
 0x15c   : > { %v1587_v32 = vpop.f32.mrb[0].mxu0  ;;  %v1611_v33 = vpop.f32.mrb[0].mxu1 }
 0x15d   : > { %v1588_v34 = vpop.f32.mrb[1].mxu0  ;;  %v1612_v35 = vpop.f32.mrb[1].mxu1 }
 0x15e   : > { %v1589_v36 = vadd.f32 %v1588_v34, %v1587_v32  ;;  %v2344_v37 = vadd.f32 %v1612_v35, %v1611_v33  ;;  %v1590_v38 = vpop.f32.mrb[2].mxu0  ;;  %v1614_v39 = vpop.f32.mrb[2].mxu1  ;;  %v1262_v32 = vld [vmem:[%s2504_s4] sm:$0xf]  ;;  %v2379_v33 = vld [vmem:[#allocation6 + $0x8] sm:$0xff] }
 0x15f   : > { %v1591_v40 = vpop.f32.mrb[3].mxu0  ;;  %v1615_v41 = vpop.f32.mrb[3].mxu1 }
 0x160   : > { %v1592_v42 = vadd.f32 %v1591_v40, %v1590_v38  ;;  %v2346_v43 = vadd.f32 %v1615_v41, %v1614_v39  ;;  %v2387_v40 = vrot.slane %v1262_v32, 7 }
 0x164   : > { %v1593_v44 = vpop.f32.mrb[4].mxu0  ;;  %v1617_v45 = vpop.f32.mrb[4].mxu1 }
 0x165   : > { %v1594_v46 = vpop.f32.mrb[5].mxu0  ;;  %v1618_v47 = vpop.f32.mrb[5].mxu1 }
 0x166   : > { %v2348_v48 = vadd.f32 %v1594_v46, %v1593_v44  ;;  %v2350_v49 = vadd.f32 %v1618_v47, %v1617_v45  ;;  %v1596_v50 = vpop.f32.mrb[6].mxu0  ;;  %v1620_v51 = vpop.f32.mrb[6].mxu1 }
 0x167   : > { %v1597_v52 = vpop.f32.mrb[7].mxu0  ;;  %v1621_v53 = vpop.f32.mrb[7].mxu1 }
 0x168   : > { %v2352_v54 = vadd.f32 %v1597_v52, %v1596_v50  ;;  %v2354_v55 = vadd.f32 %v1621_v53, %v1620_v51 }
 0x16c   : > { %v1599_v56 = vpop.f32.mrb[8].mxu0  ;;  %v1623_v57 = vpop.f32.mrb[8].mxu1 }
 0x16d   : > { %v1600_v58 = vpop.f32.mrb[9].mxu0  ;;  %v1624_v59 = vpop.f32.mrb[9].mxu1 }
 0x16e   : > { %v2356_v60 = vadd.f32 %v1600_v58, %v1599_v56  ;;  %v2358_v61 = vadd.f32 %v1624_v59, %v1623_v57  ;;  %v1602_v62 = vpop.f32.mrb[10].mxu0  ;;  %v1626_v63 = vpop.f32.mrb[10].mxu1 }
 0x16f   : > { %v1603_v0 = vpop.f32.mrb[11].mxu0  ;;  %v1627_v1 = vpop.f32.mrb[11].mxu1 }
 0x170   : > { %v2360_v2 = vadd.f32 %v1603_v0, %v1602_v62  ;;  %v2362_v3 = vadd.f32 %v1627_v1, %v1626_v63 }
 0x174   : > { %v1605_v4 = vpop.f32.mrb[12].mxu0  ;;  %v1629_v5 = vpop.f32.mrb[12].mxu1 }
 0x175   : > { %v1606_v6 = vpop.f32.mrb[13].mxu0  ;;  %v1630_v7 = vpop.f32.mrb[13].mxu1 }
 0x176   : > { %v2364_v8 = vadd.f32 %v1606_v6, %v1605_v4  ;;  %v2366_v9 = vadd.f32 %v1630_v7, %v1629_v5  ;;  %v1608_v10 = vpop.f32.mrb[14].mxu0  ;;  %v1632_v11 = vpop.f32.mrb[14].mxu1 }
 0x177   : > { %v1609_v12 = vpop.f32.mrb[15].mxu0  ;;  %v1633_v13 = vpop.f32.mrb[15].mxu1 }
 0x178   : > { %v2370_v14 = vadd.f32 %v1609_v12, %v1608_v10  ;;  %v2372_v15 = vadd.f32 %v1633_v13, %v1632_v11 }
 0x17c   : > { %v1651_v16 = vpop.f32.mrb[16].mxu1  ;;  %v1715_v17 = vpop.f32.mrb[16].mxu0 }
 0x17d   : > { %v1652_v18 = vpop.f32.mrb[17].mxu1  ;;  %v1716_v19 = vpop.f32.mrb[17].mxu0 }
 0x17e   : > { %v1653_v20 = vadd.f32 %v1652_v18, %v1651_v16  ;;  %v1717_v21 = vadd.f32 %v1716_v19, %v1715_v17  ;;  %v1654_v22 = vpop.f32.mrb[18].mxu1  ;;  %v1718_v23 = vpop.f32.mrb[18].mxu0 }
 0x17f   : > { %v1655_v24 = vpop.f32.mrb[19].mxu1  ;;  %v1719_v25 = vpop.f32.mrb[19].mxu0 }
 0x180   : > { %v1084_v26 = vadd.f32 %v1653_v20, %v1589_v36  ;;  %v1656_v27 = vadd.f32 %v1655_v24, %v1654_v22  ;;  %v1720_v28 = vadd.f32 %v1719_v25, %v1718_v23  ;;  %v2385_v36 = vld [vmem:[%s2503_s3] sm:$0x1] }
 0x182   : > { %v1181_v30 = vadd.f32 %v1717_v21, %v1084_v26  ;;  %v1087_v31 = vadd.f32 %v1656_v27, %v1592_v42 }
 0x184   : > { %v1245_v34 = vadd.f32 %v2374_v29, %v1181_v30  ;;  %v1184_v35 = vadd.f32 %v1720_v28, %v1087_v31  ;;  %v1657_v38 = vpop.f32.mrb[20].mxu1  ;;  %v1721_v39 = vpop.f32.mrb[20].mxu0 }
 0x185   : > { %v1658_v41 = vpop.f32.mrb[21].mxu1  ;;  %v1722_v42 = vpop.f32.mrb[21].mxu0 }
 0x186   : > { %v1280_v44 = vrot.slane %v1245_v34, 7  ;;  %v1246_v45 = vadd.f32 %v2379_v33, %v1184_v35  ;;  %v1659_v46 = vadd.f32 %v1658_v41, %v1657_v38  ;;  %v1723_v47 = vadd.f32 %v1722_v42, %v1721_v39  ;;  %v1660_v50 = vpop.f32.mrb[22].mxu1  ;;  %v1724_v51 = vpop.f32.mrb[22].mxu0 }
 0x187   : > { %v1661_v52 = vpop.f32.mrb[23].mxu1  ;;  %v1725_v53 = vpop.f32.mrb[23].mxu0 }
 0x188   : > { %v1331_v56 = vsel %vm1279_vm0, %v2385_v36, %v1280_v44  ;;  %v1281_v57 = vrot.slane %v1246_v45, 7  ;;  %v1092_v58 = vadd.f32 %v1659_v46, %v2348_v48  ;;  %v1662_v59 = vadd.f32 %v1661_v52, %v1660_v50 }
 0x189   : > { %1347 = vst [vmem:[%s2392_s27] sm:$0xff] %v1331_v56  ;;  %v1726_v62 = vadd.f32 %v1725_v53, %v1724_v51 }
 0x18a   : > { %v1282_v63 = vsel %vm1279_vm0, %v1280_v44, %v1281_v57  ;;  %v1339_v0 = vsel %vm1279_vm0, %v1281_v57, %v2387_v40  ;;  %v1189_v1 = vadd.f32 %v1723_v47, %v1092_v58  ;;  %v1095_v4 = vadd.f32 %v1662_v59, %v2352_v54 }
 0x18b   : > { %1348 = vst [vmem:[%s2392_s27 + $0x8] sm:$0xff] %v1282_v63  ;;  %1349 = vst [vmem:[%s2392_s27 + $0x10] sm:$0x1f] %v1339_v0 }
 0x18c   : > { %v1247_v5 = vadd.f32 %v2374_v29, %v1189_v1  ;;  %v1192_v6 = vadd.f32 %v1726_v62, %v1095_v4  ;;  %v1663_v7 = vpop.f32.mrb[24].mxu1  ;;  %v1727_v10 = vpop.f32.mrb[24].mxu0 }
 0x18d   : > { %v1664_v48 = vpop.f32.mrb[25].mxu1  ;;  %v1728_v11 = vpop.f32.mrb[25].mxu0 }
 0x18e   : > { %v1283_v12 = vrot.slane %v1247_v5, 7  ;;  %v1248_v13 = vadd.f32 %v2379_v33, %v1192_v6  ;;  %v1665_v16 = vadd.f32 %v1664_v48, %v1663_v7  ;;  %v1729_v17 = vadd.f32 %v1728_v11, %v1727_v10  ;;  %v1666_v18 = vpop.f32.mrb[26].mxu1  ;;  %v1730_v19 = vpop.f32.mrb[26].mxu0 }
 0x18f   : > { %v1667_v54 = vpop.f32.mrb[27].mxu1  ;;  %v1731_v20 = vpop.f32.mrb[27].mxu0 }
 0x190   : > { %v1332_v21 = vsel %vm1279_vm0, %v2385_v36, %v1283_v12  ;;  %v1284_v22 = vrot.slane %v1248_v13, 7  ;;  %v1100_v23 = vadd.f32 %v1665_v16, %v2356_v60  ;;  %v1668_v24 = vadd.f32 %v1667_v54, %v1666_v18 }
 0x191   : > { %1350 = vst [vmem:[%s2392_s27 + $0x18] sm:$0xff] %v1332_v21  ;;  %v1732_v25 = vadd.f32 %v1731_v20, %v1730_v19 }
 0x192   : > { %v1285_v26 = vsel %vm1279_vm0, %v1283_v12, %v1284_v22  ;;  %v1340_v27 = vsel %vm1279_vm0, %v1284_v22, %v2387_v40  ;;  %v1197_v28 = vadd.f32 %v1729_v17, %v1100_v23  ;;  %v1103_v30 = vadd.f32 %v1668_v24, %v2360_v2 }
 0x193   : > { %1351 = vst [vmem:[%s2392_s27 + $0x20] sm:$0xff] %v1285_v26  ;;  %1352 = vst [vmem:[%s2392_s27 + $0x28] sm:$0x1f] %v1340_v27 }
 0x194   : > { %v1249_v31 = vadd.f32 %v2374_v29, %v1197_v28  ;;  %v1200_v32 = vadd.f32 %v1732_v25, %v1103_v30  ;;  %v1669_v34 = vpop.f32.mrb[28].mxu1  ;;  %v1733_v35 = vpop.f32.mrb[28].mxu0 }
 0x195   : > { %v1670_v60 = vpop.f32.mrb[29].mxu1  ;;  %v1734_v38 = vpop.f32.mrb[29].mxu0 }
 0x196   : > { %v1286_v39 = vrot.slane %v1249_v31, 7  ;;  %v1250_v41 = vadd.f32 %v2379_v33, %v1200_v32  ;;  %v1671_v42 = vadd.f32 %v1670_v60, %v1669_v34  ;;  %v1735_v44 = vadd.f32 %v1734_v38, %v1733_v35  ;;  %v1672_v45 = vpop.f32.mrb[30].mxu1  ;;  %v1736_v46 = vpop.f32.mrb[30].mxu0 }
 0x197   : > { %v1673_v2 = vpop.f32.mrb[31].mxu1  ;;  %v1737_v47 = vpop.f32.mrb[31].mxu0 }
 0x198   : > { %v1333_v50 = vsel %vm1279_vm0, %v2385_v36, %v1286_v39  ;;  %v1287_v51 = vrot.slane %v1250_v41, 7  ;;  %v1108_v52 = vadd.f32 %v1671_v42, %v2364_v8  ;;  %v1674_v53 = vadd.f32 %v1673_v2, %v1672_v45 }
 0x199   : > { %1353 = vst [vmem:[%s2392_s27 + $0x30] sm:$0xff] %v1333_v50  ;;  %v1738_v56 = vadd.f32 %v1737_v47, %v1736_v46 }
 0x19a   : > { %v1288_v57 = vsel %vm1279_vm0, %v1286_v39, %v1287_v51  ;;  %v1341_v58 = vsel %vm1279_vm0, %v1287_v51, %v2387_v40  ;;  %v1205_v59 = vadd.f32 %v1735_v44, %v1108_v52  ;;  %v1111_v62 = vadd.f32 %v1674_v53, %v2370_v14 }
 0x19b   : > { %1354 = vst [vmem:[%s2392_s27 + $0x38] sm:$0xff] %v1288_v57  ;;  %1355 = vst [vmem:[%s2392_s27 + $0x40] sm:$0x1f] %v1341_v58 }
 0x19c   : > { %v1251_v63 = vadd.f32 %v2374_v29, %v1205_v59  ;;  %v1208_v0 = vadd.f32 %v1738_v56, %v1111_v62  ;;  %v1675_v1 = vpop.f32.mrb[32].mxu1  ;;  %v1739_v4 = vpop.f32.mrb[32].mxu0 }
 0x19d   : > { %v1676_v8 = vpop.f32.mrb[33].mxu1  ;;  %v1740_v5 = vpop.f32.mrb[33].mxu0 }
 0x19e   : > { %v1289_v6 = vrot.slane %v1251_v63, 7  ;;  %v1252_v7 = vadd.f32 %v2379_v33, %v1208_v0  ;;  %v1677_v10 = vadd.f32 %v1676_v8, %v1675_v1  ;;  %v1741_v48 = vadd.f32 %v1740_v5, %v1739_v4  ;;  %v1678_v11 = vpop.f32.mrb[34].mxu1  ;;  %v1742_v12 = vpop.f32.mrb[34].mxu0 }
 0x19f   : > { %v1679_v14 = vpop.f32.mrb[35].mxu1  ;;  %v1743_v13 = vpop.f32.mrb[35].mxu0 }
 0x1a0   : > { %v1334_v16 = vsel %vm1279_vm0, %v2385_v36, %v1289_v6  ;;  %v1290_v17 = vrot.slane %v1252_v7, 7  ;;  %v1116_v18 = vadd.f32 %v1677_v10, %v2344_v37  ;;  %v1680_v19 = vadd.f32 %v1679_v14, %v1678_v11 }
 0x1a1   : > { %1356 = vst [vmem:[%s2392_s27 + $0x48] sm:$0xff] %v1334_v16  ;;  %v1744_v54 = vadd.f32 %v1743_v13, %v1742_v12 }
 0x1a2   : > { %v1291_v20 = vsel %vm1279_vm0, %v1289_v6, %v1290_v17  ;;  %v1342_v21 = vsel %vm1279_vm0, %v1290_v17, %v2387_v40  ;;  %v1213_v22 = vadd.f32 %v1741_v48, %v1116_v18  ;;  %v1119_v23 = vadd.f32 %v1680_v19, %v2346_v43 }
 0x1a3   : > { %1357 = vst [vmem:[%s2392_s27 + $0x50] sm:$0xff] %v1291_v20  ;;  %1358 = vst [vmem:[%s2392_s27 + $0x58] sm:$0x1f] %v1342_v21 }
 0x1a4   : > { %v1253_v24 = vadd.f32 %v2374_v29, %v1213_v22  ;;  %v1216_v25 = vadd.f32 %v1744_v54, %v1119_v23  ;;  %v1681_v26 = vpop.f32.mrb[36].mxu1  ;;  %v1745_v27 = vpop.f32.mrb[36].mxu0 }
 0x1a5   : > { %v1682_v37 = vpop.f32.mrb[37].mxu1  ;;  %v1746_v28 = vpop.f32.mrb[37].mxu0 }
 0x1a6   : > { %v1292_v30 = vrot.slane %v1253_v24, 7  ;;  %v1254_v31 = vadd.f32 %v2379_v33, %v1216_v25  ;;  %v1683_v32 = vadd.f32 %v1682_v37, %v1681_v26  ;;  %v1747_v34 = vadd.f32 %v1746_v28, %v1745_v27  ;;  %v1684_v35 = vpop.f32.mrb[38].mxu1  ;;  %v1748_v60 = vpop.f32.mrb[38].mxu0 }
 0x1a7   : > { %v1685_v43 = vpop.f32.mrb[39].mxu1  ;;  %v1749_v38 = vpop.f32.mrb[39].mxu0 }
 0x1a8   : > { %v1335_v39 = vsel %vm1279_vm0, %v2385_v36, %v1292_v30  ;;  %v1293_v41 = vrot.slane %v1254_v31, 7  ;;  %v1124_v42 = vadd.f32 %v1683_v32, %v2350_v49  ;;  %v1686_v44 = vadd.f32 %v1685_v43, %v1684_v35 }
 0x1a9   : > { %1359 = vst [vmem:[%s2392_s27 + $0x60] sm:$0xff] %v1335_v39  ;;  %v1750_v45 = vadd.f32 %v1749_v38, %v1748_v60 }
 0x1aa   : > { %v1294_v46 = vsel %vm1279_vm0, %v1292_v30, %v1293_v41  ;;  %v1343_v2 = vsel %vm1279_vm0, %v1293_v41, %v2387_v40  ;;  %v1221_v47 = vadd.f32 %v1747_v34, %v1124_v42  ;;  %v1127_v50 = vadd.f32 %v1686_v44, %v2354_v55 }
 0x1ab   : > { %1360 = vst [vmem:[%s2392_s27 + $0x68] sm:$0xff] %v1294_v46  ;;  %1361 = vst [vmem:[%s2392_s27 + $0x70] sm:$0x1f] %v1343_v2 }
 0x1ac   : > { %v1255_v51 = vadd.f32 %v2374_v29, %v1221_v47  ;;  %v1224_v52 = vadd.f32 %v1750_v45, %v1127_v50  ;;  %v1687_v53 = vpop.f32.mrb[40].mxu1  ;;  %v1751_v56 = vpop.f32.mrb[40].mxu0 }
 0x1ad   : > { %v1688_v49 = vpop.f32.mrb[41].mxu1  ;;  %v1752_v57 = vpop.f32.mrb[41].mxu0 }
 0x1ae   : > { %v1295_v58 = vrot.slane %v1255_v51, 7  ;;  %v1256_v59 = vadd.f32 %v2379_v33, %v1224_v52  ;;  %v1689_v62 = vadd.f32 %v1688_v49, %v1687_v53  ;;  %v1753_v63 = vadd.f32 %v1752_v57, %v1751_v56  ;;  %v1690_v0 = vpop.f32.mrb[42].mxu1  ;;  %v1754_v1 = vpop.f32.mrb[42].mxu0 }
 0x1af   : > { %v1691_v55 = vpop.f32.mrb[43].mxu1  ;;  %v1755_v4 = vpop.f32.mrb[43].mxu0 }
 0x1b0   : > { %v1336_v8 = vsel %vm1279_vm0, %v2385_v36, %v1295_v58  ;;  %v1296_v5 = vrot.slane %v1256_v59, 7  ;;  %v1132_v6 = vadd.f32 %v1689_v62, %v2358_v61  ;;  %v1692_v7 = vadd.f32 %v1691_v55, %v1690_v0 }
 0x1b1   : > { %1362 = vst [vmem:[%s2392_s27 + $0x78] sm:$0xff] %v1336_v8  ;;  %v1756_v10 = vadd.f32 %v1755_v4, %v1754_v1 }
 0x1b2   : > { %v1297_v48 = vsel %vm1279_vm0, %v1295_v58, %v1296_v5  ;;  %v1344_v11 = vsel %vm1279_vm0, %v1296_v5, %v2387_v40  ;;  %v1229_v12 = vadd.f32 %v1753_v63, %v1132_v6  ;;  %v1135_v14 = vadd.f32 %v1692_v7, %v2362_v3 }
 0x1b3   : > { %1363 = vst [vmem:[%s2392_s27 + $0x80] sm:$0xff] %v1297_v48  ;;  %1364 = vst [vmem:[%s2392_s27 + $0x88] sm:$0x1f] %v1344_v11 }
 0x1b4   : > { %v1257_v13 = vadd.f32 %v2374_v29, %v1229_v12  ;;  %v1232_v16 = vadd.f32 %v1756_v10, %v1135_v14  ;;  %v1693_v17 = vpop.f32.mrb[44].mxu1  ;;  %v1757_v18 = vpop.f32.mrb[44].mxu0 }
 0x1b5   : > { %v1694_v61 = vpop.f32.mrb[45].mxu1  ;;  %v1758_v19 = vpop.f32.mrb[45].mxu0 }
 0x1b6   : > { %v1298_v54 = vrot.slane %v1257_v13, 7  ;;  %v1258_v20 = vadd.f32 %v2379_v33, %v1232_v16  ;;  %v1695_v21 = vadd.f32 %v1694_v61, %v1693_v17  ;;  %v1759_v22 = vadd.f32 %v1758_v19, %v1757_v18  ;;  %v1696_v23 = vpop.f32.mrb[46].mxu1  ;;  %v1760_v24 = vpop.f32.mrb[46].mxu0 }
 0x1b7   : > { %v1697_v3 = vpop.f32.mrb[47].mxu1  ;;  %v1761_v25 = vpop.f32.mrb[47].mxu0 }
 0x1b8   : > { %v1337_v26 = vsel %vm1279_vm0, %v2385_v36, %v1298_v54  ;;  %v1299_v27 = vrot.slane %v1258_v20, 7  ;;  %v1140_v37 = vadd.f32 %v1695_v21, %v2366_v9  ;;  %v1698_v28 = vadd.f32 %v1697_v3, %v1696_v23 }
 0x1b9   : > { %1365 = vst [vmem:[%s2392_s27 + $0x90] sm:$0xff] %v1337_v26  ;;  %v1762_v30 = vadd.f32 %v1761_v25, %v1760_v24 }
 0x1ba   : > { %v1300_v31 = vsel %vm1279_vm0, %v1298_v54, %v1299_v27  ;;  %v1345_v32 = vsel %vm1279_vm0, %v1299_v27, %v2387_v40  ;;  %v1237_v34 = vadd.f32 %v1759_v22, %v1140_v37  ;;  %v1143_v35 = vadd.f32 %v1698_v28, %v2372_v15 }
 0x1bb   : > { %1366 = vst [vmem:[%s2392_s27 + $0x98] sm:$0xff] %v1300_v31  ;;  %1367 = vst [vmem:[%s2392_s27 + $0xa0] sm:$0x1f] %v1345_v32 }
 0x1bc   : > { %v1259_v60 = vadd.f32 %v2374_v29, %v1237_v34  ;;  %v1240_v43 = vadd.f32 %v1762_v30, %v1143_v35 }
 0x1be   : > { %v1301_v9 = vrot.slane %v1259_v60, 7  ;;  %v1260_v38 = vadd.f32 %v2379_v33, %v1240_v43 }
 0x1c0   : > { %v1338_v39 = vsel %vm1279_vm0, %v2385_v36, %v1301_v9  ;;  %v1302_v41 = vrot.slane %v1260_v38, 7 }
 0x1c1   : > { %1368 = vst [vmem:[%s2392_s27 + $0xa8] sm:$0xff] %v1338_v39 }
 0x1c2   : > { %v1303_v42 = vsel %vm1279_vm0, %v1301_v9, %v1302_v41  ;;  %v1346_v44 = vsel %vm1279_vm0, %v1302_v41, %v2387_v40 }
 0x1c3   : > { %1369 = vst [vmem:[%s2392_s27 + $0xb0] sm:$0xff] %v1303_v42  ;;  %1370 = vst [vmem:[%s2392_s27 + $0xb8] sm:$0x1f] %v1346_v44 }
 0x1c4 PF: > { %p16_p6 = scmp.ge.s32.totalorder %s2230_s14, 6   ;;  %s2518_s18 = smov %s2085_s19 }
 0x1c5   : > { %s2519_s19 = smov %s2089_s20  ;;  %s2520_s20 = smov %s2239_s17 }
 0x1c6   : > { %s2521_s21 = smov %s2230_s14  ;;  %18 = sbr.rel (!%p16_p6) target bundleno = 4 (0x4), region = 88 }
 0x1cd   :  { %1395 = vsyncpa [#allocation3], 1 }
 0x1ce   :  { %1397 = vsyncpa [#allocation3 + $0x1], 1 }
 0x1cf   :  { %1398 = vsyncpa [#allocation5], 1 }

</bundles_post_ra>
